<compile_context>
chip_gen: v7x
topology: tpu7x:2x2x1
jax: 0.10.0
libtpu: 0.0.40
codegen_flags: <defaults>
</compile_context>

<pallas_src>
import jax
import jax.numpy as jnp
from jax import lax
from jax.experimental import pallas as pl
from jax.experimental.pallas import tpu as pltpu

# ----------------------------- "config" constants -----------------------------
# Real module: cfg.INPUT.MIN_SIZE_TEST == 800, MAX_SIZE_TEST == 1333, size_div == 32.
# Toy-scale stand-ins (same logic, small shapes):
MIN_SIZE_TEST = 32
MAX_SIZE_TEST = 64
SIZE_DIVISIBILITY = 32
STEM_COUT = 64
# Detectron2 COCO pixel statistics, BGR order (the model's input_format).
PIXEL_MEAN_BGR = (103.530, 116.280, 123.675)
PIXEL_STD_BGR = (1.0, 1.0, 1.0)


# ---------------------------------------------------------------------------
# Kernel 1: fused  255*x -> bilinear resize -> normalize -> divisibility pad
# ---------------------------------------------------------------------------
def resize_and_normalize(x_rgb_nchw, rh255, rwt, newh, neww):
    """x_rgb_nchw: (B, 3, Hin, Win) bf16 RGB in [0,1].
    rh255: (Hpad, Hin) bf16  (bilinear rows * 255, zero rows >= newh).
    rwt:   (Win, Wpad) bf16  (bilinear cols, transposed, zero cols >= neww).
    Returns (B, 3, Hpad, Wpad) f32, BGR, normalized, zero in the pad region."""
    B, C, Hin, Win = x_rgb_nchw.shape
    Hpad = rh255.shape[0]
    Wpad = rwt.shape[1]
    need_mask = (newh < Hpad) or (neww < Wpad)

    def kernel(x_ref, rh_ref, rwt_ref, o_ref):
        if need_mask:
            rows = lax.broadcasted_iota(jnp.int32, (Hpad, Wpad), 0)
            cols = lax.broadcasted_iota(jnp.int32, (Hpad, Wpad), 1)
            valid = (rows < newh) & (cols < neww)
        for c_bgr in range(C):
            c_rgb = C - 1 - c_bgr                      # BGR flip folded into indexing
            x_c = x_ref[0, c_rgb]                      # (Hin, Win) bf16
            t = jnp.dot(rh_ref[...], x_c,
                        preferred_element_type=jnp.float32)          # (Hpad, Win) f32
            y = jnp.dot(t.astype(jnp.bfloat16), rwt_ref[...],
                        preferred_element_type=jnp.float32)          # (Hpad, Wpad) f32
            y = (y - PIXEL_MEAN_BGR[c_bgr]) * (1.0 / PIXEL_STD_BGR[c_bgr])
            if need_mask:
                # Module pads with 0 AFTER normalization; the zero rows/cols of Rh/RwT
                # would otherwise leave -mean/std in the pad region.
                y = jnp.where(valid, y, 0.0)
            o_ref[0, c_bgr] = y

    return pl.pallas_call(
        kernel,
        out_shape=jax.ShapeDtypeStruct((B, C, Hpad, Wpad), jnp.float32),
        grid_spec=pltpu.PrefetchScalarGridSpec(
            num_scalar_prefetch=0,
            grid=(B,),
            in_specs=[
                pl.BlockSpec((1, C, Hin, Win), lambda b: (b, 0, 0, 0)),
                pl.BlockSpec((Hpad, Hin), lambda b: (0, 0)),   # grid-invariant, DMA'd once
                pl.BlockSpec((Win, Wpad), lambda b: (0, 0)),   # grid-invariant, DMA'd once
            ],
            out_specs=pl.BlockSpec((1, C, Hpad, Wpad), lambda b: (b, 0, 0, 0)),
        ),
        compiler_params=pltpu.CompilerParams(
            dimension_semantics=("parallel",),
            vmem_limit_bytes=48 * 1024 * 1024,   # budget that also fits v7x's 64 MiB VMEM
        ),
    )(x_rgb_nchw, rh255, rwt)


# ---------------------------------------------------------------------------
# Kernel 2: backbone stem conv (7x7 / stride 2) as P-tiled im2col matmul + ReLU
# ---------------------------------------------------------------------------
def _stem_kernel(wt_ref, b_ref, p_ref, o_ref):
    acc = jnp.dot(wt_ref[...], p_ref[0],
                  preferred_element_type=jnp.float32)      # (Cout, TP) f32
    o_ref[0] = jnp.maximum(acc + b_ref[...], 0.0)


def stem_conv_matmul(patches_t, wt, bias):
    """patches_t: (B, K, P) bf16 (im2col, K-major); wt: (Cout, K) bf16; bias: (Cout, 1) f32.
    Returns (B, Cout, P) f32 = relu(wt @ patches + bias), tiled over P."""
    B, K, P = patches_t.shape
    Cout = wt.shape[0]
    # Biggest lane-dense P-tile that divides P (P is a multiple of 256 because the padded
    # image dims are multiples of SIZE_DIVISIBILITY=32).  Small per-step blocks (~150-300 KB)
    # => fits VMEM at real 800x1344 scale on all generations, pipelines DMA behind the MXU,
    # and gives enough grid steps to shard across v7x's 2 TensorCores.
    TP = 512 if P % 512 == 0 else (256 if P % 256 == 0 else P)
    return pl.pallas_call(
        _stem_kernel,
        out_shape=jax.ShapeDtypeStruct((B, Cout, P), jnp.float32),
        grid_spec=pltpu.PrefetchScalarGridSpec(
            num_scalar_prefetch=0,
            grid=(B, P // TP),
            in_specs=[
                pl.BlockSpec((Cout, K), lambda b, p: (0, 0)),   # resident weights
                pl.BlockSpec((Cout, 1), lambda b, p: (0, 0)),
                pl.BlockSpec((1, K, TP), lambda b, p: (b, 0, p)),
            ],
            out_specs=pl.BlockSpec((1, Cout, TP), lambda b, p: (b, 0, p)),
        ),
        compiler_params=pltpu.CompilerParams(
            dimension_semantics=("parallel", "parallel"),
        ),
    )(wt, bias, patches_t)


# ------------------------------- JAX glue ----------------------------------
def _shortest_edge_size(h, w, short=MIN_SIZE_TEST, max_size=MAX_SIZE_TEST):
    # detectron2 T.ResizeShortestEdge target-size logic
    scale = short / min(h, w)
    if h < w:
        newh, neww = short, scale * w
    else:
        newh, neww = scale * h, short
    if max(newh, neww) > max_size:
        s = max_size / max(newh, neww)
        newh, neww = newh * s, neww * s
    return int(newh + 0.5), int(neww + 0.5)


def _bilinear_resize_matrix(out_size, in_size):
    # half-pixel-center bilinear (align_corners=False), as an (out, in) matrix
    dst = jnp.arange(out_size, dtype=jnp.float32)
    src = (dst + 0.5) * (in_size / out_size) - 0.5
    src = jnp.clip(src, 0.0, in_size - 1.0)
    i0 = jnp.floor(src).astype(jnp.int32)
    i1 = jnp.minimum(i0 + 1, in_size - 1)
    w1 = src - i0.astype(jnp.float32)
    w0 = 1.0 - w1
    return (jax.nn.one_hot(i0, in_size, dtype=jnp.float32) * w0[:, None]
            + jax.nn.one_hot(i1, in_size, dtype=jnp.float32) * w1[:, None])


def detectron2_estimate_forward(x, stem_key):
    """x: (B, H, W, 3) float32 RGB in [0,1]. Returns stem features (B, 64, H', W')."""
    assert x.ndim == 4 and x.shape[3] == 3
    B, H, W, C = x.shape

    # NHWC -> NCHW (kept in RGB, bf16).  The BGR flip and the x*255 scale are folded into
    # the Pallas kernel (channel indexing / Rh matrix): no extra HBM pass for either.
    x_nchw = jnp.transpose(x, (0, 3, 1, 2)).astype(jnp.bfloat16)

    # ResizeShortestEdge(MIN_SIZE_TEST, MAX_SIZE_TEST) as matmul matrices, pre-padded to
    # the size_divisibility-padded output shape so the divisibility pad is fused into
    # kernel 1 and the subsequent jnp.pad (a full HBM read+write) disappears.
    newh, neww = _shortest_edge_size(H, W)
    hpad = -(-newh // SIZE_DIVISIBILITY) * SIZE_DIVISIBILITY
    wpad = -(-neww // SIZE_DIVISIBILITY) * SIZE_DIVISIBILITY
    rh255 = jnp.pad(_bilinear_resize_matrix(newh, H) * 255.0,
                    ((0, hpad - newh), (0, 0))).astype(jnp.bfloat16)       # (Hpad, Hin)
    rwt = jnp.pad(_bilinear_resize_matrix(neww, W),
                  ((0, wpad - neww), (0, 0))).T.astype(jnp.bfloat16)       # (Win, Wpad)

    images = resize_and_normalize(x_nchw, rh255, rwt, newh, neww)  # (B,3,Hpad,Wpad) f32 BGR

    # Backbone stem: 7x7/2 conv, 3->64, + ReLU.  im2col stays in XLA glue (bf16 to halve
    # its HBM traffic); the matmul is Pallas, tiled over the P = Hc*Wc patch axis.
    # TODO(synk): fuse im2col into the Pallas stem kernel (haloed manual-DMA image tiles)
    # to remove the remaining 49x patch materialization through HBM.
    patches = lax.conv_general_dilated_patches(
        images.astype(jnp.bfloat16), filter_shape=(7, 7), window_strides=(2, 2),
        padding=((3, 3), (3, 3)),
        dimension_numbers=("NCHW", "OIHW", "NCHW"))                  # (B, 3*49, Hc, Wc)
    _, K, Hc, Wc = patches.shape
    patches_t = patches.reshape(B, K, Hc * Wc)                       # (B, K, P), K-major

    # Deterministic synthetic stem weights (He init) — the real module loads a checkpoint.
    # NOTE: with real weights the OIHW -> (Cout, K) reshape must match
    # conv_general_dilated_patches' tap ordering and the BGR fold above.
    wt = (jax.random.normal(stem_key, (STEM_COUT, K), dtype=jnp.float32)
          * (2.0 / K) ** 0.5).astype(jnp.bfloat16)
    bias = jnp.zeros((STEM_COUT, 1), dtype=jnp.float32)

    feats = stem_conv_matmul(patches_t, wt, bias)                    # (B, Cout, P)
    feats = feats.reshape(B, STEM_COUT, Hc, Wc)                      # NCHW (P = Hc*Wc)

    # TODO(synk): FPN stages, RPN proposal_generator, roi_heads (box/mask heads, NMS),
    # detector_postprocess and mask Quantize produce dynamic-length Instances and need
    # pretrained weights — no clean Pallas equivalent; returning stem features instead.
    return feats


if __name__ == "__main__":
    key = jax.random.PRNGKey(0)
    k_img, k_stem = jax.random.split(key)
    B, H, W, C = 2, 16, 16, 3
    x = jax.random.uniform(k_img, (B, H, W, C), dtype=jnp.float32)   # in [0, 1)
    assert 0.0 <= float(x.min()) <= float(x.max()) <= 1.0

    feats = detectron2_estimate_forward(x, k_stem)
    jax.block_until_ready(feats)
    assert feats.shape == (B, STEM_COUT, 16, 16) and feats.dtype == jnp.float32
    print("KERNEL_OK")
</pallas_src>

<mosaic_0001>
module attributes {stable_mosaic.version = 11 : i64} {
  func.func @kernel(%arg0: i32, %arg1: memref<1x3x16x16xbf16, #tpu.memory_space<vmem>>, %arg2: memref<32x16xbf16, #tpu.memory_space<vmem>>, %arg3: memref<16x32xbf16, #tpu.memory_space<vmem>>, %arg4: memref<1x3x32x32xf32, #tpu.memory_space<vmem>>) attributes {dimension_semantics = [#tpu.dimension_semantics<parallel>], iteration_bounds = array<i64: 2>, scalar_prefetch = 0 : i64, scratch_operands = 0 : i64, tpu.core_type = #tpu.core_type<tc>, window_params = [{transform_indices = @transform_0, window_bounds = array<i64: 1, 3, 16, 16>}, {pipeline_mode = #tpu.pipeline_mode<synchronous>, transform_indices = @transform_1, window_bounds = array<i64: 32, 16>}, {pipeline_mode = #tpu.pipeline_mode<synchronous>, transform_indices = @transform_2, window_bounds = array<i64: 16, 32>}, {transform_indices = @transform_3, window_bounds = array<i64: 1, 3, 32, 32>}]} {
    %c0 = arith.constant 0 : index
    %c2 = arith.constant 2 : index
    %c0_0 = arith.constant 0 : index
    %c0_1 = arith.constant 0 : index
    %0 = vector.load %arg1[%c0, %c2, %c0_0, %c0_1] : memref<1x3x16x16xbf16, #tpu.memory_space<vmem>>, vector<1x1x16x16xbf16>
    %1 = vector.shape_cast %0 : vector<1x1x16x16xbf16> to vector<16x16xbf16>
    %c0_2 = arith.constant 0 : index
    %c0_3 = arith.constant 0 : index
    %2 = vector.load %arg2[%c0_2, %c0_3] : memref<32x16xbf16, #tpu.memory_space<vmem>>, vector<32x16xbf16>
    %cst = arith.constant dense<0.000000e+00> : vector<32x16xf32>
    %3 = tpu.matmul %2, %1, %cst {dimension_numbers = #tpu.dot_dimension_numbers<[1], [0], [0], [1], [0, 0, 1, 1], [], []>} : vector<32x16xbf16>, vector<16x16xbf16>, vector<32x16xf32> -> vector<32x16xf32>
    %4 = arith.truncf %3 : vector<32x16xf32> to vector<32x16xbf16>
    %c0_4 = arith.constant 0 : index
    %c0_5 = arith.constant 0 : index
    %5 = vector.load %arg3[%c0_4, %c0_5] : memref<16x32xbf16, #tpu.memory_space<vmem>>, vector<16x32xbf16>
    %cst_6 = arith.constant dense<0.000000e+00> : vector<32x32xf32>
    %6 = tpu.matmul %4, %5, %cst_6 {dimension_numbers = #tpu.dot_dimension_numbers<[1], [0], [0], [1], [0, 0, 1, 1], [], []>} : vector<32x16xbf16>, vector<16x32xbf16>, vector<32x32xf32> -> vector<32x32xf32>
    %cst_7 = arith.constant 1.035300e+02 : f32
    %7 = vector.broadcast %cst_7 : f32 to vector<32x32xf32>
    %8 = arith.subf %6, %7 : vector<32x32xf32>
    %cst_8 = arith.constant 1.000000e+00 : f32
    %9 = vector.broadcast %cst_8 : f32 to vector<32x32xf32>
    %10 = arith.mulf %8, %9 : vector<32x32xf32>
    %c0_9 = arith.constant 0 : index
    %c0_10 = arith.constant 0 : index
    %c0_11 = arith.constant 0 : index
    %c0_12 = arith.constant 0 : index
    %11 = vector.load %arg4[%c0_9, %c0_10, %c0_11, %c0_12] : memref<1x3x32x32xf32, #tpu.memory_space<vmem>>, vector<1x1x32x32xf32>
    %12 = vector.shape_cast %11 : vector<1x1x32x32xf32> to vector<32x32xf32>
    %13 = vector.shape_cast %10 : vector<32x32xf32> to vector<1x1x32x32xf32>
    tpu.vector_store %arg4[%c0_9, %c0_10, %c0_11, %c0_12], %13 {strides = array<i32>} : memref<1x3x32x32xf32, #tpu.memory_space<vmem>>, vector<1x1x32x32xf32>,
    %c0_13 = arith.constant 0 : index
    %c1 = arith.constant 1 : index
    %c0_14 = arith.constant 0 : index
    %c0_15 = arith.constant 0 : index
    %14 = vector.load %arg1[%c0_13, %c1, %c0_14, %c0_15] : memref<1x3x16x16xbf16, #tpu.memory_space<vmem>>, vector<1x1x16x16xbf16>
    %15 = vector.shape_cast %14 : vector<1x1x16x16xbf16> to vector<16x16xbf16>
    %c0_16 = arith.constant 0 : index
    %c0_17 = arith.constant 0 : index
    %16 = vector.load %arg2[%c0_16, %c0_17] : memref<32x16xbf16, #tpu.memory_space<vmem>>, vector<32x16xbf16>
    %cst_18 = arith.constant dense<0.000000e+00> : vector<32x16xf32>
    %17 = tpu.matmul %16, %15, %cst_18 {dimension_numbers = #tpu.dot_dimension_numbers<[1], [0], [0], [1], [0, 0, 1, 1], [], []>} : vector<32x16xbf16>, vector<16x16xbf16>, vector<32x16xf32> -> vector<32x16xf32>
    %18 = arith.truncf %17 : vector<32x16xf32> to vector<32x16xbf16>
    %c0_19 = arith.constant 0 : index
    %c0_20 = arith.constant 0 : index
    %19 = vector.load %arg3[%c0_19, %c0_20] : memref<16x32xbf16, #tpu.memory_space<vmem>>, vector<16x32xbf16>
    %cst_21 = arith.constant dense<0.000000e+00> : vector<32x32xf32>
    %20 = tpu.matmul %18, %19, %cst_21 {dimension_numbers = #tpu.dot_dimension_numbers<[1], [0], [0], [1], [0, 0, 1, 1], [], []>} : vector<32x16xbf16>, vector<16x32xbf16>, vector<32x32xf32> -> vector<32x32xf32>
    %cst_22 = arith.constant 1.162800e+02 : f32
    %21 = vector.broadcast %cst_22 : f32 to vector<32x32xf32>
    %22 = arith.subf %20, %21 : vector<32x32xf32>
    %cst_23 = arith.constant 1.000000e+00 : f32
    %23 = vector.broadcast %cst_23 : f32 to vector<32x32xf32>
    %24 = arith.mulf %22, %23 : vector<32x32xf32>
    %c0_24 = arith.constant 0 : index
    %c1_25 = arith.constant 1 : index
    %c0_26 = arith.constant 0 : index
    %c0_27 = arith.constant 0 : index
    %25 = vector.load %arg4[%c0_24, %c1_25, %c0_26, %c0_27] : memref<1x3x32x32xf32, #tpu.memory_space<vmem>>, vector<1x1x32x32xf32>
    %26 = vector.shape_cast %25 : vector<1x1x32x32xf32> to vector<32x32xf32>
    %27 = vector.shape_cast %24 : vector<32x32xf32> to vector<1x1x32x32xf32>
    tpu.vector_store %arg4[%c0_24, %c1_25, %c0_26, %c0_27], %27 {strides = array<i32>} : memref<1x3x32x32xf32, #tpu.memory_space<vmem>>, vector<1x1x32x32xf32>,
    %c0_28 = arith.constant 0 : index
    %c0_29 = arith.constant 0 : index
    %c0_30 = arith.constant 0 : index
    %c0_31 = arith.constant 0 : index
    %28 = vector.load %arg1[%c0_28, %c0_29, %c0_30, %c0_31] : memref<1x3x16x16xbf16, #tpu.memory_space<vmem>>, vector<1x1x16x16xbf16>
    %29 = vector.shape_cast %28 : vector<1x1x16x16xbf16> to vector<16x16xbf16>
    %c0_32 = arith.constant 0 : index
    %c0_33 = arith.constant 0 : index
    %30 = vector.load %arg2[%c0_32, %c0_33] : memref<32x16xbf16, #tpu.memory_space<vmem>>, vector<32x16xbf16>
    %cst_34 = arith.constant dense<0.000000e+00> : vector<32x16xf32>
    %31 = tpu.matmul %30, %29, %cst_34 {dimension_numbers = #tpu.dot_dimension_numbers<[1], [0], [0], [1], [0, 0, 1, 1], [], []>} : vector<32x16xbf16>, vector<16x16xbf16>, vector<32x16xf32> -> vector<32x16xf32>
    %32 = arith.truncf %31 : vector<32x16xf32> to vector<32x16xbf16>
    %c0_35 = arith.constant 0 : index
    %c0_36 = arith.constant 0 : index
    %33 = vector.load %arg3[%c0_35, %c0_36] : memref<16x32xbf16, #tpu.memory_space<vmem>>, vector<16x32xbf16>
    %cst_37 = arith.constant dense<0.000000e+00> : vector<32x32xf32>
    %34 = tpu.matmul %32, %33, %cst_37 {dimension_numbers = #tpu.dot_dimension_numbers<[1], [0], [0], [1], [0, 0, 1, 1], [], []>} : vector<32x16xbf16>, vector<16x32xbf16>, vector<32x32xf32> -> vector<32x32xf32>
    %cst_38 = arith.constant 1.236750e+02 : f32
    %35 = vector.broadcast %cst_38 : f32 to vector<32x32xf32>
    %36 = arith.subf %34, %35 : vector<32x32xf32>
    %cst_39 = arith.constant 1.000000e+00 : f32
    %37 = vector.broadcast %cst_39 : f32 to vector<32x32xf32>
    %38 = arith.mulf %36, %37 : vector<32x32xf32>
    %c0_40 = arith.constant 0 : index
    %c2_41 = arith.constant 2 : index
    %c0_42 = arith.constant 0 : index
    %c0_43 = arith.constant 0 : index
    %39 = vector.load %arg4[%c0_40, %c2_41, %c0_42, %c0_43] : memref<1x3x32x32xf32, #tpu.memory_space<vmem>>, vector<1x1x32x32xf32>
    %40 = vector.shape_cast %39 : vector<1x1x32x32xf32> to vector<32x32xf32>
    %41 = vector.shape_cast %38 : vector<32x32xf32> to vector<1x1x32x32xf32>
    tpu.vector_store %arg4[%c0_40, %c2_41, %c0_42, %c0_43], %41 {strides = array<i32>} : memref<1x3x32x32xf32, #tpu.memory_space<vmem>>, vector<1x1x32x32xf32>,
    return
  }
  func.func @transform_0(%arg0: i32) -> (i32, i32, i32, i32) {
    %c0_i32 = arith.constant 0 : i32
    %c0_i32_0 = arith.constant 0 : i32
    %c0_i32_1 = arith.constant 0 : i32
    %c0_i32_2 = arith.constant 0 : i32
    return %arg0, %c0_i32, %c0_i32_0, %c0_i32_1 : i32, i32, i32, i32
  }
  func.func @transform_1(%arg0: i32) -> (i32, i32) {
    %c0_i32 = arith.constant 0 : i32
    %c0_i32_0 = arith.constant 0 : i32
    %c0_i32_1 = arith.constant 0 : i32
    return %c0_i32, %c0_i32_0 : i32, i32
  }
  func.func @transform_2(%arg0: i32) -> (i32, i32) {
    %c0_i32 = arith.constant 0 : i32
    %c0_i32_0 = arith.constant 0 : i32
    %c0_i32_1 = arith.constant 0 : i32
    return %c0_i32, %c0_i32_0 : i32, i32
  }
  func.func @transform_3(%arg0: i32) -> (i32, i32, i32, i32) {
    %c0_i32 = arith.constant 0 : i32
    %c0_i32_0 = arith.constant 0 : i32
    %c0_i32_1 = arith.constant 0 : i32
    %c0_i32_2 = arith.constant 0 : i32
    return %arg0, %c0_i32, %c0_i32_0, %c0_i32_1 : i32, i32, i32, i32
  }
}

</mosaic_0001>

<bundles_post_ra>
// kernel: tpu_custom_call.1
= control target key start
LH: loop header
LB: loop body
LE: loop exit
PB: predicated region body
PF: predicated region fallthrough
CT: control target
= control target key end

     0   :  { %8 = vsyncpa [#allocation3], 0  ;;  %s1257_s0 = inlined_call_operand.hbm [shape: bf16[2,3,16,16], index: 0, kind: input, shape index: {}]   ;;  %s1258_s1 = inlined_call_operand.vmem [shape: bf16[32,16], index: 1, kind: input, shape index: {}]   ;;  %s1259_s2 = inlined_call_operand.vmem [shape: bf16[16,32], index: 2, kind: input, shape index: {}]   ;;  %s1260_s3 = inlined_call_operand.hbm [shape: f32[2,3,32,32], index: 3, kind: output, shape index: {}]  }
   0x1   :  { %10 = vsyncpa [#allocation3 + $0x1], 0 }
   0x2   :  { %11 = vsyncpa [#allocation4], 0 }
   0x3   :  { %13 = vsyncpa [#allocation4 + $0x1], 0  ;;  %s1034_s12 = smov 0   ;;  %s1036_s13 = smov 0  }
   0x4   :  { %s1038_s14 = smov 0   ;;  %s1040_s15 = smov 0  }
   0x5 LB: > { %s1055_s16 = sadd.s32 4294967295, %s1006_s15   ;;  %s733_s17 = sadd.s32 4294967294, %s1006_s15   ;;  %s1006_s15 = sphi %s1040_s15, %s1272_s15   ;;  %s1002_s14 = sphi %s1038_s14, %s1271_s14   ;;  %s998_s13 = sphi %s1036_s13, %s1270_s13   ;;  %s994_s12 = sphi %s1034_s12, %s1269_s12  }
   0x6   : > { %s1059_s18 = sadd.s32 1, %s1006_s15   ;;  %s26_s19 = sadd.s32 1, %s1002_s14 }
   0x7   : > { %s23_s20 = ssub.s32 %s1006_s15, %s1059_s18  ;;  %p33_p0 = scmp.ne.s32.totalorder %s1002_s14, %s998_s13 }
   0x8   : > { %p24_p1 = scmp.eq.s32.totalorder %s23_s20, 0  ;;  %p34_p2 = scmp.eq.s32.totalorder %s1006_s15, 0 }
   0x9   : > { %p39_p3 = scmp.ne.s32.totalorder %s998_s13, %s994_s12  ;;  %p40_p4 = scmp.eq.s32.totalorder %s1055_s16, 0 }
   0xa   : > { %s1071_s21 = scalar_select %p24_p1, %s1002_s14, %s26_s19  }
   0xb   : > { %p35_p5 = por %p34_p2, %p33_p0  ;;  %p1073_p6 = por %p40_p4, %p39_p3 }
   0xc   : > { %p105_p7 = scmp.eq.s32.totalorder %s1055_s16, 1  ;;  %p111_p8 = scmp.eq.s32.totalorder %s733_s17, 1 }
   0xd   : > { %p860_p10 = scmp.lt.s32.totalorder %s1006_s15, 2  ;;  %s137_s25 = sand.u32 1, %s1002_s14  }
   0xe   : > { %p1080_p11 = por %p105_p7, %p33_p0  ;;  %p1084_p12 = por %p111_p8, %p39_p3 }
   0xf   : > { %s844_s26 = smul.u32 384, %s1006_s15  ;;  %p1095_p13 = pnand %p860_p10, %p35_p5 }
  0x10   : > { %s1263_s23 = scalar_select %p1080_p11, 1, 0 }
  0x11   : > { %s1264_s24 = scalar_select %p1084_p12, 1, 0 }
  0x12   : > { %s843_s27 = smul.u32 24, %s137_s25  ;;  %s1093_s30 = scalar_lea.hbm %s1257_s0, %s844_s26 }
  0x13   : > { %s1101_s7 = scalar_lea.sflag [#allocation3], %s137_s25  ;;  %s910_s8 = scalar_lea.hbm %s1093_s30, 384 }
  0x14   : > { %s141_s5 = scalar_lea.vmem [#allocation2], %s843_s27  ;;  %p911_p0 = scmp.ne.s32.totalorder %s1093_s30, %s910_s8 }
  0x15   : > { %s148_s6 = sshll.u32 %s141_s5, 4  ;;  %p912_p1 = pneg %p1095_p13  ;;  %s1099_s6 = int_to_ptr.vmem [resolvable:$true] %s148_s6 }
  0x16   : > { %s915_s11 = scalar_lea.hbm %s1257_s0, 768  ;;  %p916_p4 = scmp.lt.u32.totalorder %s1093_s30, %s1257_s0 }
  0x17   : > { %p913_p2 = pnand %p912_p1, %p911_p0  ;;  %p917_p5 = scmp.lt.u32.totalorder %s915_s11, %s910_s8 }
  0x18   : > { %p919_p8 = scmp.lt.u32.totalorder %s910_s8, %s1093_s30 }
  0x19   : > { %p914_p3 = pneg %p913_p2  ;;  %p918_p7 = por %p917_p5, %p916_p4 }
  0x1b   : > { %p920_p10 = por %p919_p8, %p918_p7 }
  0x1d   : > { %p921_p9 = pnand %p920_p10, %p914_p3 }
  0x1f   : > { %924 = shalt.err (!%p921_p9)
}
  0x20   : > { %s925_s20 = scalar_lea.vmem %s1099_s6, 384  ;;  %s1008_s25 = smov [#allocation2]  }
  0x21   : > { %p926_p0 = scmp.ne.s32.totalorder %s1099_s6, %s925_s20  ;;  %s930_s26 = sshll.u32 %s1008_s25, 4  ;;  %s931_s26 = int_to_ptr.vmem [resolvable:$false] %s930_s26 }
  0x22   : > { %s932_s27 = scalar_lea.vmem %s931_s26, 768  ;;  %p933_p11 = scmp.lt.s32.totalorder %s1099_s6, %s931_s26 }
  0x23   : > { %p928_p2 = pnand %p926_p0, %p912_p1  ;;  %p934_p4 = scmp.lt.s32.totalorder %s932_s27, %s925_s20 }
  0x25   : > { %p929_p12 = pneg %p928_p2  ;;  %p935_p5 = por %p934_p4, %p933_p11 }
  0x27   : > { %p936_p7 = pnand %p935_p5, %p929_p12 }
  0x29   : > { %939 = shalt.err (!%p936_p7)
}
  0x2a   : > { %s1009_s28 = smov 64   ;;  %s1010_s29 = smov 4  }
  0x2b   : > { %855 = dma.hbm_to_vmem [thread:$0]  (!%p1095_p13), %s1093_s30, 384, %s1099_s6, %s1101_s7, %s1009_s28, %s1009_s28, %s1010_s29  }
  0x2c   : > { %p737_p9 = scmp.ge.s32.totalorder %s1006_s15, 1  ;;  %p156_p1 = scmp.lt.s32.totalorder %s1006_s15, 3 }
  0x2e   : > { %p157_p3 = pnand %p737_p9, %p156_p1 }
  0x2f   : > { %s1132_s5 = sand.u32 (!%p157_p3), 1, %s998_s13  }
  0x30   : > { %160 = sbr.rel (%p157_p3) target bundleno = 527 (0x20f), region = 32  ;;  %s163_s9 = scalar_lea.sflag (!%p157_p3), [#allocation3], %s1132_s5 }
  0x31   : > { %s845_s8 = smul.u32 (!%p157_p3), 24, %s1132_s5 }
  0x33   : > { %s166_s10 = scalar_lea.vmem (!%p157_p3), [#allocation2], %s845_s8 }
  0x37   : > { %985 = dma.done.wait (%p1073_p6), %s163_s9, 384  }
  0x38   : > { %987 = vsyncadd (%p1073_p6), %s163_s9, 4294966912  ;;  %v898_v0 = vld [vmem:[%s166_s10 + $0x10] sm:$0xff]   ;;  %vm213_vm0 = vcmask 130048   ;;  %v899_v1 = vld [vmem:[%s1258_s1] sm:$0xff]   ;;  %s846_s4 = smul.u32 96, %s1132_s5  ;;  %vm338_vm1 = vcmask 261120  }
  0x39   : > { %807 = vmatprep.subr.bf16.mxu0 %v898_v0  ;;  %v900_v2 = vld [vmem:[%s1258_s1 + $0x8] sm:$0xff]   ;;  %809 = vmatprep.mubr.msk.bf16.mxu0 %vm213_vm0, %v899_v1  ;;  %v902_v4 = vld [vmem:[%s1258_s1] sm:$0xff]   ;;  %s847_s7 = smul.u32 1536, %s1055_s16  ;;  %s647_s16 = scalar_lea.sflag [#allocation4], %s1132_s5 }
  0x3a   : > { %808 = vmatpush3.bf16.msra.mxu0 %v898_v0  ;;  %v901_v3 = vld [vmem:[%s166_s10 + $0x8] sm:$0xff]   ;;  %v904_v5 = vld [vmem:[%s166_s10] sm:$0xff]   ;;  %s1180_s6 = scalar_lea.vmem [#allocation5], %s846_s4  ;;  %p1266_p11 = scmp.ne.s32.totalorder %s1263_s23, 0 }
  0x3b   : > { %819 = vmatprep.subr.bf16.mxu0 %v901_v3  ;;  %v903_v6 = vld [vmem:[%s1258_s1 + $0x8] sm:$0xff]   ;;  %v905_v7 = vld [vmem:[%s1258_s1] sm:$0xff]   ;;  %s660_s11 = sshll.u32 %s1180_s6, 4  ;;  %s1205_s19 = scalar_lea.hbm %s1260_s3, %s847_s7  ;;  %s1207_s11 = int_to_ptr.vmem [resolvable:$true] %s660_s11 }
  0x3c   : > { %v906_v8 = vld [vmem:[%s1258_s1 + $0x8] sm:$0xff]   ;;  %v907_v9 = vld [vmem:[%s1259_s2] sm:$0xff]   ;;  %s940_s20 = scalar_lea.vmem %s1207_s11, 1536  ;;  %s1011_s25 = smov [#allocation5]  }
  0x3d   : > { %810 = vmatmul.mubr.msk.bf16.vlgmr.msra.gmra.mrb[0].mxu0 %vm213_vm0, %v900_v2  ;;  %813 = vmatprep.subr.bf16.mxu1 %v907_v9  ;;  %v908_v10 = vld [vmem:[%s1259_s2] sm:$0xff]   ;;  %p941_p6 = scmp.ne.s32.totalorder %s1207_s11, %s940_s20  ;;  %s944_s26 = sshll.u32 %s1011_s25, 4  ;;  %s945_s26 = int_to_ptr.vmem [resolvable:$false] %s944_s26 }
  0x3e   : > { %820 = vmatpush3.bf16.msra.mxu0 %v901_v3  ;;  %821 = vmatprep.mubr.msk.bf16.mxu0 %vm213_vm0, %v902_v4  ;;  %v909_v17 = vld [vmem:[%s1259_s2] sm:$0xff]   ;;  %s946_s27 = scalar_lea.vmem %s945_s26, 3072  ;;  %p947_p8 = scmp.lt.s32.totalorder %s1207_s11, %s945_s26 }
  0x3f   : > { %831 = vmatprep.subr.bf16.mxu0 %v904_v5  ;;  %814 = vmatpush3.bf16.msra.mxu1 %v907_v9  ;;  %p942_p12 = pnand %p941_p6, %p1266_p11  ;;  %p948_p10 = scmp.lt.s32.totalorder %s946_s27, %s940_s20 }
  0x40   : > { %825 = vmatprep.subr.bf16.mxu1 %v908_v10 }
  0x41   : > { %p943_p13 = pneg %p942_p12  ;;  %p949_p0 = por %p948_p10, %p947_p8 }
  0x43   : > { %p950_p2 = pnand %p949_p0, %p943_p13 }
  0x45   : > { %822 = vmatmul.mubr.msk.bf16.vlgmr.msra.gmra.mrb[4].mxu0 %vm213_vm0, %v903_v6 }
  0x46   : > { %832 = vmatpush3.bf16.msra.mxu0 %v904_v5  ;;  %833 = vmatprep.mubr.msk.bf16.mxu0 %vm213_vm0, %v905_v7 }
  0x4d   : > { %834 = vmatmul.mubr.msk.bf16.vlgmr.msra.gmra.mrb[8].mxu0 %vm213_vm0, %v906_v8 }
 0x110   : > { %v811_v11 = vpop.f32.mrb[0].mxu0 }
 0x111   : > { %v254_v12 = vpop.f32.mrb[1].mxu0 }
 0x112   : > { %v812_v13 = vpop.f32.mrb[2].mxu0 }
 0x113   : > { %v270_v14 = vpack.c.bf16 %v812_v13, %v811_v11  ;;  %v257_v15 = vpop.f32.mrb[3].mxu0 }
 0x114   : > { %v269_v16 = vpack.c.bf16 %v257_v15, %v254_v12 }
 0x116   : > { %815 = vmatprep.mubr.msk.bf16.mxu1 %vm213_vm0, %v269_v16 }
 0x117   : > { %816 = vmatmul.mubr.msk.bf16.vlgmr.msra.gmra.mrb[0].mxu1 %vm213_vm0, %v270_v14 }
 0x118   : > { %v823_v18 = vpop.f32.mrb[4].mxu0  ;;  %826 = vmatpush3.bf16.msra.mxu1 %v908_v10 }
 0x119   : > { %v406_v19 = vpop.f32.mrb[5].mxu0  ;;  %837 = vmatprep.subr.bf16.mxu1 %v909_v17 }
 0x11a   : > { %v824_v20 = vpop.f32.mrb[6].mxu0 }
 0x11b   : > { %v422_v21 = vpack.c.bf16 %v824_v20, %v823_v18  ;;  %v409_v22 = vpop.f32.mrb[7].mxu0 }
 0x11c   : > { %v421_v23 = vpack.c.bf16 %v409_v22, %v406_v19 }
 0x11e   : > { %827 = vmatprep.mubr.msk.bf16.mxu1 %vm213_vm0, %v421_v23 }
 0x11f   : > { %828 = vmatmul.mubr.msk.bf16.vlgmr.msra.gmra.mrb[4].mxu1 %vm213_vm0, %v422_v21 }
 0x120   : > { %v835_v24 = vpop.f32.mrb[8].mxu0  ;;  %838 = vmatpush3.bf16.msra.mxu1 %v909_v17 }
 0x121   : > { %v557_v25 = vpop.f32.mrb[9].mxu0 }
 0x122   : > { %v836_v26 = vpop.f32.mrb[10].mxu0 }
 0x123   : > { %v573_v27 = vpack.c.bf16 %v836_v26, %v835_v24  ;;  %v560_v28 = vpop.f32.mrb[11].mxu0 }
 0x124   : > { %v572_v29 = vpack.c.bf16 %v560_v28, %v557_v25 }
 0x126   : > { %839 = vmatprep.mubr.msk.bf16.mxu1 %vm213_vm0, %v572_v29 }
 0x127   : > { %840 = vmatmul.mubr.msk.bf16.vlgmr.msra.gmra.mrb[8].mxu1 %vm213_vm0, %v573_v27 }
 0x1ea   : > { %v817_v30 = vpop.f32.mrb[0].mxu1 }
 0x1eb   : > { %v750_v31 = vadd.f32 -103.53, %v817_v30  ;;  %v319_v32 = vpop.f32.mrb[1].mxu1 }
 0x1ec   : > { %v748_v33 = vadd.f32 -103.53, %v319_v32  ;;  %v818_v34 = vpop.f32.mrb[2].mxu1 }
 0x1ed   : > { %341 = vst.msk [vmem:[%s1180_s6 + $0x10] sm:$0xff] %vm338_vm1, %v750_v31  ;;  %v751_v35 = vadd.f32 -103.53, %v818_v34  ;;  %v322_v36 = vpop.f32.mrb[3].mxu1 }
 0x1ee   : > { %339 = vst.msk [vmem:[%s1180_s6] sm:$0xff] %vm338_vm1, %v748_v33  ;;  %v749_v37 = vadd.f32 -103.53, %v322_v36 }
 0x1ef   : > { %342 = vst.msk [vmem:[%s1180_s6 + $0x18] sm:$0xff] %vm338_vm1, %v751_v35 }
 0x1f0   : > { %340 = vst.msk [vmem:[%s1180_s6 + $0x8] sm:$0xff] %vm338_vm1, %v749_v37 }
 0x1f2   : > { %v829_v38 = vpop.f32.mrb[4].mxu1 }
 0x1f3   : > { %v764_v39 = vadd.f32 -116.28, %v829_v38  ;;  %v471_v40 = vpop.f32.mrb[5].mxu1 }
 0x1f4   : > { %v762_v41 = vadd.f32 -116.28, %v471_v40  ;;  %v830_v42 = vpop.f32.mrb[6].mxu1 }
 0x1f5   : > { %768 = vst.msk [vmem:[%s1180_s6 + $0x30] sm:$0xff] %vm338_vm1, %v764_v39  ;;  %v765_v43 = vadd.f32 -116.28, %v830_v42  ;;  %v474_v44 = vpop.f32.mrb[7].mxu1 }
 0x1f6   : > { %766 = vst.msk [vmem:[%s1180_s6 + $0x20] sm:$0xff] %vm338_vm1, %v762_v41  ;;  %v763_v45 = vadd.f32 -116.28, %v474_v44 }
 0x1f7   : > { %769 = vst.msk [vmem:[%s1180_s6 + $0x38] sm:$0xff] %vm338_vm1, %v765_v43 }
 0x1f8   : > { %767 = vst.msk [vmem:[%s1180_s6 + $0x28] sm:$0xff] %vm338_vm1, %v763_v45 }
 0x1fa   : > { %v841_v46 = vpop.f32.mrb[8].mxu1 }
 0x1fb   : > { %v780_v47 = vadd.f32 -123.675, %v841_v46  ;;  %v622_v48 = vpop.f32.mrb[9].mxu1 }
 0x1fc   : > { %v778_v49 = vadd.f32 -123.675, %v622_v48  ;;  %v842_v50 = vpop.f32.mrb[10].mxu1 }
 0x1fd   : > { %784 = vst.msk [vmem:[%s1180_s6 + $0x50] sm:$0xff] %vm338_vm1, %v780_v47  ;;  %v781_v51 = vadd.f32 -123.675, %v842_v50  ;;  %v625_v52 = vpop.f32.mrb[11].mxu1 }
 0x1fe   : > { %782 = vst.msk [vmem:[%s1180_s6 + $0x40] sm:$0xff] %vm338_vm1, %v778_v49  ;;  %v779_v53 = vadd.f32 -123.675, %v625_v52 }
 0x1ff   : > { %785 = vst.msk [vmem:[%s1180_s6 + $0x58] sm:$0xff] %vm338_vm1, %v781_v51 }
 0x200   : > { %783 = vst.msk [vmem:[%s1180_s6 + $0x48] sm:$0xff] %vm338_vm1, %v779_v53 }
 0x201   : > { %953 = shalt.err (!%p950_p2)
}
 0x202   : > { %s954_s28 = scalar_lea.hbm %s1205_s19, 1536  ;;  %s958_s9 = scalar_lea.hbm %s1260_s3, 3072 }
 0x203   : > { %p955_p4 = scmp.ne.s32.totalorder %s1205_s19, %s954_s28  ;;  %p959_p9 = scmp.lt.u32.totalorder %s1205_s19, %s1260_s3 }
 0x204   : > { %p960_p1 = scmp.lt.u32.totalorder %s958_s9, %s954_s28  ;;  %p962_p6 = scmp.lt.u32.totalorder %s954_s28, %s1205_s19 }
 0x205   : > { %p956_p5 = pnand %p955_p4, %p1266_p11 }
 0x206   : > { %p961_p3 = por %p960_p1, %p959_p9 }
 0x207   : > { %p957_p7 = pneg %p956_p5 }
 0x208   : > { %p963_p12 = por %p962_p6, %p961_p3 }
 0x20a   : > { %p964_p13 = pnand %p963_p12, %p957_p7 }
 0x20c   : > { %967 = shalt.err (!%p964_p13)
}
 0x20d   : > { %s1012_s4 = smov 128   ;;  %s1013_s6 = smov 8  }
 0x20e   : > { %850 = dma.vmem_to_hbm [thread:$0]  (%p1266_p11), %s1207_s11, 1536, %s1205_s19, %s647_s16, %s1012_s4, %s1012_s4, %s1013_s6  }
 0x20f PF: > { %s675_s7 = sand.u32 1, %s994_s12   ;;  %p1267_p8 = scmp.ne.s32.totalorder %s1264_s24, 0 }
 0x210   : > { %p1268_p10 = scmp.ge.s32.totalorder %s1006_s15, 2  ;;  %s676_s17 = scalar_lea.sflag [#allocation4], %s675_s7 }
 0x212   : > { %p857_p0 = pnand %p1268_p10, %p1267_p8 }
 0x214   : > { %989 = dma.done.wait (!%p857_p0), %s676_s17, 1536  }
 0x215   : > { %991 = vsyncadd (!%p857_p0), %s676_s17, 4294965760  ;;  %p16_p2 = scmp.ge.s32.totalorder %s1059_s18, 4   ;;  %s1269_s12 = smov %s998_s13 }
 0x216   : > { %s1270_s13 = smov %s1002_s14  ;;  %s1271_s14 = smov %s1071_s21 }
 0x217   : > { %s1272_s15 = smov %s1059_s18  ;;  %18 = sbr.rel (!%p16_p2) target bundleno = 5 (0x5), region = 81 }
 0x21e   :  { %681 = vsyncpa [#allocation3], 1 }
 0x21f   :  { %683 = vsyncpa [#allocation3 + $0x1], 1 }
 0x220   :  { %684 = vsyncpa [#allocation4], 1 }
 0x221   :  { %686 = vsyncpa [#allocation4 + $0x1], 1 }

</bundles_post_ra>
